<compile_context>
chip_gen: v7x
topology: tpu7x:2x2x1
jax: 0.10.0
libtpu: 0.0.40
codegen_flags: <defaults>
</compile_context>

<pallas_src>
import functools

import jax
import jax.numpy as jnp
import numpy as np
from jax.experimental import pallas as pl
from jax.experimental.pallas import tpu as pltpu


def _build_tap_masks(H, W, batch_tile):
    """(9, batch_tile*H*W) f32 {0,1} masks, per-image coordinates, tap-major."""
    HW = H * W
    L = batch_tile * HW
    p = np.arange(L)
    pp = p % HW                      # per-image pixel index (batch folded on lanes)
    row = pp // W
    col = pp % W
    masks = np.ones((9, L), dtype=np.float32)
    t = 0
    for dh in (-1, 0, 1):
        for dw in (-1, 0, 1):
            m = np.ones(L, dtype=bool)
            if dh < 0:
                m &= row >= -dh
            if dh > 0:
                m &= row < H - dh
            if dw < 0:
                m &= col >= -dw
            if dw > 0:
                m &= col < W - dw
            masks[t] = m.astype(np.float32)
            t += 1
    return jnp.asarray(masks)


def _pack_weights(w_hwio, C, Cp, dtype):
    """(kh, kw, cin, cout) -> (cout, 9*Cp), columns ordered (tap, cin_padded)."""
    w = jnp.transpose(w_hwio, (3, 0, 1, 2)).reshape(C, 9, C)     # (cout, tap, cin)
    w = jnp.pad(w, ((0, 0), (0, 0), (0, Cp - C)))                # zero-pad cin -> Cp
    return w.reshape(C, 9 * Cp).astype(dtype)


def _resblock_kernel(mask_ref, x_ref, w1_ref, b1_ref, w2_ref, b2_ref,
                     out_ref, stack_ref, *, H, W, Cp):
    """Block shapes:
         mask_ref  : (9, L)       f32 {0,1} border masks (tap-major), L = B*H*W
         x_ref     : (C, L)       input (channels on sublanes, pixels on lanes)
         w*_ref    : (C, 9*Cp)    im2col conv weights (columns = (tap, cin_padded))
         b*_ref    : (C, 1)       conv biases (lane-broadcast)
         out_ref   : (C, L)
         stack_ref : (9*Cp, L)    f32 VMEM scratch holding the aligned im2col stack
    """
    C, L = x_ref.shape
    taps = [(dh, dw) for dh in (-1, 0, 1) for dw in (-1, 0, 1)]
    mm_dtype = w1_ref.dtype          # weights pre-cast in the wrapper (f32 or bf16)

    # Zero once so the Cp-padding rows of every tap block stay zero across both
    # convs (and across grid steps).  Skipped entirely when C is already 8-aligned.
    if Cp != C:
        stack_ref[...] = jnp.zeros_like(stack_ref)

    x2d = x_ref[...]                 # (C, L) f32

    def conv3x3(src, w_ref, b_ref):
        # Build the 9 shifted, zero-padded taps in registers (roll = XLU slot,
        # mask = one VPU mul) and store each at an 8-aligned sublane offset of
        # the scratch -> one aligned MXU matmul per conv.
        for t, (dh, dw) in enumerate(taps):
            shift = (-(dh * W + dw)) % L
            v = pltpu.roll(src, shift=shift, axis=1) if shift else src
            if not (dh == 0 and dw == 0):
                v = v * mask_ref[pl.ds(t, 1), :]          # zero invalid / wrapped lanes
            stack_ref[pl.ds(t * Cp, C), :] = v
        acc = jnp.dot(w_ref[...], stack_ref[...].astype(mm_dtype),
                      preferred_element_type=jnp.float32)  # (C, L) f32 accumulation
        return acc + b_ref[...]                             # (C, 1) lane-broadcast bias

    h = jnp.maximum(conv3x3(x2d, w1_ref, b1_ref), 0.0)       # conv1 + ReLU (f32)
    y = conv3x3(h, w2_ref, b2_ref)                           # conv2
    out_ref[...] = jnp.maximum(x2d + y, 0.0).astype(out_ref.dtype)  # residual + ReLU


@functools.partial(jax.jit, static_argnames=("use_bf16_matmul", "batch_tile"))
def resblock_pallas(x_nchw, w1, b1, w2, b2, use_bf16_matmul=False, batch_tile=None):
    """x_nchw: (N, C, H, W) float32.
       w*: (3, 3, Cin, Cout) == PyTorch Conv2d weight (Cout, Cin, kh, kw)
           transposed to (kh, kw, Cin, Cout).   b*: (C,).
       batch_tile: images per grid step (defaults to N -> single grid step)."""
    N, C, H, W = x_nchw.shape
    HW = H * W
    if batch_tile is None:
        batch_tile = N               # small problems: one grid step, one TC
    assert N % batch_tile == 0
    num_tiles = N // batch_tile
    L = batch_tile * HW              # lane extent per grid step
    Cp = ((C + 7) // 8) * 8          # per-tap sublane stride (8-aligned)

    mm_dtype = jnp.bfloat16 if use_bf16_matmul else jnp.float32

    # (N, C, H, W) -> (C, N*H*W): channels on sublanes, batch folded into lanes.
    x_cl = jnp.transpose(x_nchw, (1, 0, 2, 3)).reshape(C, N * HW)

    masks = _build_tap_masks(H, W, batch_tile)               # (9, L) constant
    w1_flat = _pack_weights(w1, C, Cp, mm_dtype)             # pre-cast (no in-kernel weight cast)
    w2_flat = _pack_weights(w2, C, Cp, mm_dtype)
    b1_col = b1.reshape(C, 1).astype(jnp.float32)
    b2_col = b2.reshape(C, 1).astype(jnp.float32)

    kernel = functools.partial(_resblock_kernel, H=H, W=W, Cp=Cp)

    out_cl = pl.pallas_call(
        kernel,
        out_shape=jax.ShapeDtypeStruct((C, N * HW), x_nchw.dtype),
        grid_spec=pltpu.PrefetchScalarGridSpec(
            num_scalar_prefetch=0,
            grid=(num_tiles,),
            in_specs=[
                pl.BlockSpec((9, L), lambda t: (0, 0)),        # border masks (constant)
                pl.BlockSpec((C, L), lambda t: (0, t)),        # input tile
                pl.BlockSpec((C, 9 * Cp), lambda t: (0, 0)),   # conv1 weights
                pl.BlockSpec((C, 1), lambda t: (0, 0)),        # conv1 bias
                pl.BlockSpec((C, 9 * Cp), lambda t: (0, 0)),   # conv2 weights
                pl.BlockSpec((C, 1), lambda t: (0, 0)),        # conv2 bias
            ],
            out_specs=pl.BlockSpec((C, L), lambda t: (0, t)),
            scratch_shapes=[pltpu.VMEM((9 * Cp, L), jnp.float32)],
        ),
        compiler_params=pltpu.CompilerParams(
            dimension_semantics=("parallel",) if num_tiles > 1 else ("arbitrary",),
            vmem_limit_bytes=32 * 1024 * 1024,
        ),
    )(masks, x_cl, w1_flat, b1_col, w2_flat, b2_col)

    return out_cl.reshape(C, N, H, W).transpose(1, 0, 2, 3)


def resblock_reference(x_nchw, w1, b1, w2, b2):
    """Pure-JAX reference with identical semantics (for verification)."""
    def conv(inp, w, b):
        out = jax.lax.conv_general_dilated(
            inp, w, window_strides=(1, 1), padding="SAME",
            dimension_numbers=("NCHW", "HWIO", "NCHW"))
        return out + b.reshape(1, -1, 1, 1)

    h = jax.nn.relu(conv(x_nchw, w1, b1))
    y = conv(h, w2, b2)
    return jax.nn.relu(x_nchw + y)


if __name__ == "__main__":
    # Small shapes consistent with ResBlock(channels=4) on a 16x16 feature map.
    N, C, H, W = 2, 4, 16, 16
    key = jax.random.PRNGKey(0)
    kx, kw1, kb1, kw2, kb2 = jax.random.split(key, 5)

    x = jax.random.normal(kx, (N, C, H, W), dtype=jnp.float32)

    # PyTorch Conv2d weight (out, in, kh, kw) corresponds to w[kh, kw, in, out] here.
    w1 = jax.random.normal(kw1, (3, 3, C, C), dtype=jnp.float32) * 0.2
    b1 = jax.random.normal(kb1, (C,), dtype=jnp.float32) * 0.1
    w2 = jax.random.normal(kw2, (3, 3, C, C), dtype=jnp.float32) * 0.2
    b2 = jax.random.normal(kb2, (C,), dtype=jnp.float32) * 0.1

    ref = resblock_reference(x, w1, b1, w2, b2)

    # f32 path (matches the PyTorch module numerics).
    out = jax.block_until_ready(resblock_pallas(x, w1, b1, w2, b2))
    np.testing.assert_allclose(np.asarray(out), np.asarray(ref),
                               rtol=1e-4, atol=1e-4)

    # bf16-operand MXU path (useful on v5e/v6e/v7x): f32 accumulation + f32
    # epilogue; intentionally diverges slightly from the f32 PyTorch numerics.
    out_bf16 = jax.block_until_ready(
        resblock_pallas(x, w1, b1, w2, b2, use_bf16_matmul=True))
    np.testing.assert_allclose(np.asarray(out_bf16), np.asarray(ref),
                               rtol=1e-1, atol=1e-1)

    print("KERNEL_OK")
</pallas_src>

<mosaic_0001>
module attributes {stable_mosaic.version = 11 : i64} {
  func.func @_resblock_kernel(%arg0: i32, %arg1: memref<9x512xf32, #tpu.memory_space<vmem>>, %arg2: memref<4x512xf32, #tpu.memory_space<vmem>>, %arg3: memref<4x72xf32, #tpu.memory_space<vmem>>, %arg4: memref<4x1xf32, #tpu.memory_space<vmem>>, %arg5: memref<4x72xf32, #tpu.memory_space<vmem>>, %arg6: memref<4x1xf32, #tpu.memory_space<vmem>>, %arg7: memref<4x512xf32, #tpu.memory_space<vmem>>, %arg8: memref<72x512xf32, #tpu.memory_space<vmem>>) attributes {dimension_semantics = [#tpu.dimension_semantics<arbitrary>], iteration_bounds = array<i64: 1>, scalar_prefetch = 0 : i64, scratch_operands = 1 : i64, tpu.core_type = #tpu.core_type<tc>, window_params = [{pipeline_mode = #tpu.pipeline_mode<synchronous>, transform_indices = @transform_0, window_bounds = array<i64: 9, 512>}, {transform_indices = @transform_1, window_bounds = array<i64: 4, 512>}, {pipeline_mode = #tpu.pipeline_mode<synchronous>, transform_indices = @transform_2, window_bounds = array<i64: 4, 72>}, {pipeline_mode = #tpu.pipeline_mode<synchronous>, transform_indices = @transform_3, window_bounds = array<i64: 4, 1>}, {pipeline_mode = #tpu.pipeline_mode<synchronous>, transform_indices = @transform_4, window_bounds = array<i64: 4, 72>}, {pipeline_mode = #tpu.pipeline_mode<synchronous>, transform_indices = @transform_5, window_bounds = array<i64: 4, 1>}, {transform_indices = @transform_6, window_bounds = array<i64: 4, 512>}]} {
    %cst = arith.constant 0.000000e+00 : f32
    %0 = vector.broadcast %cst : f32 to vector<72x512xf32>
    %c0 = arith.constant 0 : index
    %c0_0 = arith.constant 0 : index
    %1 = vector.load %arg8[%c0, %c0_0] : memref<72x512xf32, #tpu.memory_space<vmem>>, vector<72x512xf32>
    tpu.vector_store %arg8[%c0, %c0_0], %0 {strides = array<i32>} : memref<72x512xf32, #tpu.memory_space<vmem>>, vector<72x512xf32>,
    %c0_1 = arith.constant 0 : index
    %c0_2 = arith.constant 0 : index
    %2 = vector.load %arg2[%c0_1, %c0_2] : memref<4x512xf32, #tpu.memory_space<vmem>>, vector<4x512xf32>
    %c17_i32 = arith.constant 17 : i32
    %3 = tpu.dynamic_rotate %2 by %c17_i32 dim 1 : vector<4x512xf32>, i32 -> vector<4x512xf32>
    %c0_3 = arith.constant 0 : index
    %c0_4 = arith.constant 0 : index
    %4 = vector.load %arg1[%c0_3, %c0_4] : memref<9x512xf32, #tpu.memory_space<vmem>>, vector<1x512xf32>
    %5 = vector.broadcast %4 : vector<1x512xf32> to vector<4x512xf32>
    %6 = arith.mulf %3, %5 : vector<4x512xf32>
    %c0_5 = arith.constant 0 : index
    %c0_6 = arith.constant 0 : index
    %7 = vector.load %arg8[%c0_5, %c0_6] : memref<72x512xf32, #tpu.memory_space<vmem>>, vector<4x512xf32>
    tpu.vector_store %arg8[%c0_5, %c0_6], %6 {strides = array<i32>} : memref<72x512xf32, #tpu.memory_space<vmem>>, vector<4x512xf32>,
    %c16_i32 = arith.constant 16 : i32
    %8 = tpu.dynamic_rotate %2 by %c16_i32 dim 1 : vector<4x512xf32>, i32 -> vector<4x512xf32>
    %c1 = arith.constant 1 : index
    %c0_7 = arith.constant 0 : index
    %9 = vector.load %arg1[%c1, %c0_7] : memref<9x512xf32, #tpu.memory_space<vmem>>, vector<1x512xf32>
    %10 = vector.broadcast %9 : vector<1x512xf32> to vector<4x512xf32>
    %11 = arith.mulf %8, %10 : vector<4x512xf32>
    %c8 = arith.constant 8 : index
    %c0_8 = arith.constant 0 : index
    %12 = vector.load %arg8[%c8, %c0_8] : memref<72x512xf32, #tpu.memory_space<vmem>>, vector<4x512xf32>
    tpu.vector_store %arg8[%c8, %c0_8], %11 {strides = array<i32>} : memref<72x512xf32, #tpu.memory_space<vmem>>, vector<4x512xf32>,
    %c15_i32 = arith.constant 15 : i32
    %13 = tpu.dynamic_rotate %2 by %c15_i32 dim 1 : vector<4x512xf32>, i32 -> vector<4x512xf32>
    %c2 = arith.constant 2 : index
    %c0_9 = arith.constant 0 : index
    %14 = vector.load %arg1[%c2, %c0_9] : memref<9x512xf32, #tpu.memory_space<vmem>>, vector<1x512xf32>
    %15 = vector.broadcast %14 : vector<1x512xf32> to vector<4x512xf32>
    %16 = arith.mulf %13, %15 : vector<4x512xf32>
    %c16 = arith.constant 16 : index
    %c0_10 = arith.constant 0 : index
    %17 = vector.load %arg8[%c16, %c0_10] : memref<72x512xf32, #tpu.memory_space<vmem>>, vector<4x512xf32>
    tpu.vector_store %arg8[%c16, %c0_10], %16 {strides = array<i32>} : memref<72x512xf32, #tpu.memory_space<vmem>>, vector<4x512xf32>,
    %c1_i32 = arith.constant 1 : i32
    %18 = tpu.dynamic_rotate %2 by %c1_i32 dim 1 : vector<4x512xf32>, i32 -> vector<4x512xf32>
    %c3 = arith.constant 3 : index
    %c0_11 = arith.constant 0 : index
    %19 = vector.load %arg1[%c3, %c0_11] : memref<9x512xf32, #tpu.memory_space<vmem>>, vector<1x512xf32>
    %20 = vector.broadcast %19 : vector<1x512xf32> to vector<4x512xf32>
    %21 = arith.mulf %18, %20 : vector<4x512xf32>
    %c24 = arith.constant 24 : index
    %c0_12 = arith.constant 0 : index
    %22 = vector.load %arg8[%c24, %c0_12] : memref<72x512xf32, #tpu.memory_space<vmem>>, vector<4x512xf32>
    tpu.vector_store %arg8[%c24, %c0_12], %21 {strides = array<i32>} : memref<72x512xf32, #tpu.memory_space<vmem>>, vector<4x512xf32>,
    %c32 = arith.constant 32 : index
    %c0_13 = arith.constant 0 : index
    %23 = vector.load %arg8[%c32, %c0_13] : memref<72x512xf32, #tpu.memory_space<vmem>>, vector<4x512xf32>
    tpu.vector_store %arg8[%c32, %c0_13], %2 {strides = array<i32>} : memref<72x512xf32, #tpu.memory_space<vmem>>, vector<4x512xf32>,
    %c511_i32 = arith.constant 511 : i32
    %24 = tpu.dynamic_rotate %2 by %c511_i32 dim 1 : vector<4x512xf32>, i32 -> vector<4x512xf32>
    %c5 = arith.constant 5 : index
    %c0_14 = arith.constant 0 : index
    %25 = vector.load %arg1[%c5, %c0_14] : memref<9x512xf32, #tpu.memory_space<vmem>>, vector<1x512xf32>
    %26 = vector.broadcast %25 : vector<1x512xf32> to vector<4x512xf32>
    %27 = arith.mulf %24, %26 : vector<4x512xf32>
    %c40 = arith.constant 40 : index
    %c0_15 = arith.constant 0 : index
    %28 = vector.load %arg8[%c40, %c0_15] : memref<72x512xf32, #tpu.memory_space<vmem>>, vector<4x512xf32>
    tpu.vector_store %arg8[%c40, %c0_15], %27 {strides = array<i32>} : memref<72x512xf32, #tpu.memory_space<vmem>>, vector<4x512xf32>,
    %c497_i32 = arith.constant 497 : i32
    %29 = tpu.dynamic_rotate %2 by %c497_i32 dim 1 : vector<4x512xf32>, i32 -> vector<4x512xf32>
    %c6 = arith.constant 6 : index
    %c0_16 = arith.constant 0 : index
    %30 = vector.load %arg1[%c6, %c0_16] : memref<9x512xf32, #tpu.memory_space<vmem>>, vector<1x512xf32>
    %31 = vector.broadcast %30 : vector<1x512xf32> to vector<4x512xf32>
    %32 = arith.mulf %29, %31 : vector<4x512xf32>
    %c48 = arith.constant 48 : index
    %c0_17 = arith.constant 0 : index
    %33 = vector.load %arg8[%c48, %c0_17] : memref<72x512xf32, #tpu.memory_space<vmem>>, vector<4x512xf32>
    tpu.vector_store %arg8[%c48, %c0_17], %32 {strides = array<i32>} : memref<72x512xf32, #tpu.memory_space<vmem>>, vector<4x512xf32>,
    %c496_i32 = arith.constant 496 : i32
    %34 = tpu.dynamic_rotate %2 by %c496_i32 dim 1 : vector<4x512xf32>, i32 -> vector<4x512xf32>
    %c7 = arith.constant 7 : index
    %c0_18 = arith.constant 0 : index
    %35 = vector.load %arg1[%c7, %c0_18] : memref<9x512xf32, #tpu.memory_space<vmem>>, vector<1x512xf32>
    %36 = vector.broadcast %35 : vector<1x512xf32> to vector<4x512xf32>
    %37 = arith.mulf %34, %36 : vector<4x512xf32>
    %c56 = arith.constant 56 : index
    %c0_19 = arith.constant 0 : index
    %38 = vector.load %arg8[%c56, %c0_19] : memref<72x512xf32, #tpu.memory_space<vmem>>, vector<4x512xf32>
    tpu.vector_store %arg8[%c56, %c0_19], %37 {strides = array<i32>} : memref<72x512xf32, #tpu.memory_space<vmem>>, vector<4x512xf32>,
    %c495_i32 = arith.constant 495 : i32
    %39 = tpu.dynamic_rotate %2 by %c495_i32 dim 1 : vector<4x512xf32>, i32 -> vector<4x512xf32>
    %c8_20 = arith.constant 8 : index
    %c0_21 = arith.constant 0 : index
    %40 = vector.load %arg1[%c8_20, %c0_21] : memref<9x512xf32, #tpu.memory_space<vmem>>, vector<1x512xf32>
    %41 = vector.broadcast %40 : vector<1x512xf32> to vector<4x512xf32>
    %42 = arith.mulf %39, %41 : vector<4x512xf32>
    %c64 = arith.constant 64 : index
    %c0_22 = arith.constant 0 : index
    %43 = vector.load %arg8[%c64, %c0_22] : memref<72x512xf32, #tpu.memory_space<vmem>>, vector<4x512xf32>
    tpu.vector_store %arg8[%c64, %c0_22], %42 {strides = array<i32>} : memref<72x512xf32, #tpu.memory_space<vmem>>, vector<4x512xf32>,
    %c0_23 = arith.constant 0 : index
    %c0_24 = arith.constant 0 : index
    %44 = vector.load %arg3[%c0_23, %c0_24] : memref<4x72xf32, #tpu.memory_space<vmem>>, vector<4x72xf32>
    %c0_25 = arith.constant 0 : index
    %c0_26 = arith.constant 0 : index
    %45 = vector.load %arg8[%c0_25, %c0_26] : memref<72x512xf32, #tpu.memory_space<vmem>>, vector<72x512xf32>
    %cst_27 = arith.constant dense<0.000000e+00> : vector<4x512xf32>
    %46 = tpu.matmul %44, %45, %cst_27 {dimension_numbers = #tpu.dot_dimension_numbers<[1], [0], [0], [1], [0, 0, 1, 1], [], []>} : vector<4x72xf32>, vector<72x512xf32>, vector<4x512xf32> -> vector<4x512xf32>
    %c0_28 = arith.constant 0 : index
    %c0_29 = arith.constant 0 : index
    %47 = vector.load %arg4[%c0_28, %c0_29] : memref<4x1xf32, #tpu.memory_space<vmem>>, vector<4x1xf32>
    %48 = vector.broadcast %47 : vector<4x1xf32> to vector<4x512xf32>
    %49 = arith.addf %46, %48 : vector<4x512xf32>
    %cst_30 = arith.constant 0.000000e+00 : f32
    %50 = vector.broadcast %cst_30 : f32 to vector<4x512xf32>
    %51 = arith.maximumf %49, %50 : vector<4x512xf32>
    %c17_i32_31 = arith.constant 17 : i32
    %52 = tpu.dynamic_rotate %51 by %c17_i32_31 dim 1 : vector<4x512xf32>, i32 -> vector<4x512xf32>
    %c0_32 = arith.constant 0 : index
    %c0_33 = arith.constant 0 : index
    %53 = vector.load %arg1[%c0_32, %c0_33] : memref<9x512xf32, #tpu.memory_space<vmem>>, vector<1x512xf32>
    %54 = vector.broadcast %53 : vector<1x512xf32> to vector<4x512xf32>
    %55 = arith.mulf %52, %54 : vector<4x512xf32>
    %c0_34 = arith.constant 0 : index
    %c0_35 = arith.constant 0 : index
    %56 = vector.load %arg8[%c0_34, %c0_35] : memref<72x512xf32, #tpu.memory_space<vmem>>, vector<4x512xf32>
    tpu.vector_store %arg8[%c0_34, %c0_35], %55 {strides = array<i32>} : memref<72x512xf32, #tpu.memory_space<vmem>>, vector<4x512xf32>,
    %c16_i32_36 = arith.constant 16 : i32
    %57 = tpu.dynamic_rotate %51 by %c16_i32_36 dim 1 : vector<4x512xf32>, i32 -> vector<4x512xf32>
    %c1_37 = arith.constant 1 : index
    %c0_38 = arith.constant 0 : index
    %58 = vector.load %arg1[%c1_37, %c0_38] : memref<9x512xf32, #tpu.memory_space<vmem>>, vector<1x512xf32>
    %59 = vector.broadcast %58 : vector<1x512xf32> to vector<4x512xf32>
    %60 = arith.mulf %57, %59 : vector<4x512xf32>
    %c8_39 = arith.constant 8 : index
    %c0_40 = arith.constant 0 : index
    %61 = vector.load %arg8[%c8_39, %c0_40] : memref<72x512xf32, #tpu.memory_space<vmem>>, vector<4x512xf32>
    tpu.vector_store %arg8[%c8_39, %c0_40], %60 {strides = array<i32>} : memref<72x512xf32, #tpu.memory_space<vmem>>, vector<4x512xf32>,
    %c15_i32_41 = arith.constant 15 : i32
    %62 = tpu.dynamic_rotate %51 by %c15_i32_41 dim 1 : vector<4x512xf32>, i32 -> vector<4x512xf32>
    %c2_42 = arith.constant 2 : index
    %c0_43 = arith.constant 0 : index
    %63 = vector.load %arg1[%c2_42, %c0_43] : memref<9x512xf32, #tpu.memory_space<vmem>>, vector<1x512xf32>
    %64 = vector.broadcast %63 : vector<1x512xf32> to vector<4x512xf32>
    %65 = arith.mulf %62, %64 : vector<4x512xf32>
    %c16_44 = arith.constant 16 : index
    %c0_45 = arith.constant 0 : index
    %66 = vector.load %arg8[%c16_44, %c0_45] : memref<72x512xf32, #tpu.memory_space<vmem>>, vector<4x512xf32>
    tpu.vector_store %arg8[%c16_44, %c0_45], %65 {strides = array<i32>} : memref<72x512xf32, #tpu.memory_space<vmem>>, vector<4x512xf32>,
    %c1_i32_46 = arith.constant 1 : i32
    %67 = tpu.dynamic_rotate %51 by %c1_i32_46 dim 1 : vector<4x512xf32>, i32 -> vector<4x512xf32>
    %c3_47 = arith.constant 3 : index
    %c0_48 = arith.constant 0 : index
    %68 = vector.load %arg1[%c3_47, %c0_48] : memref<9x512xf32, #tpu.memory_space<vmem>>, vector<1x512xf32>
    %69 = vector.broadcast %68 : vector<1x512xf32> to vector<4x512xf32>
    %70 = arith.mulf %67, %69 : vector<4x512xf32>
    %c24_49 = arith.constant 24 : index
    %c0_50 = arith.constant 0 : index
    %71 = vector.load %arg8[%c24_49, %c0_50] : memref<72x512xf32, #tpu.memory_space<vmem>>, vector<4x512xf32>
    tpu.vector_store %arg8[%c24_49, %c0_50], %70 {strides = array<i32>} : memref<72x512xf32, #tpu.memory_space<vmem>>, vector<4x512xf32>,
    %c32_51 = arith.constant 32 : index
    %c0_52 = arith.constant 0 : index
    %72 = vector.load %arg8[%c32_51, %c0_52] : memref<72x512xf32, #tpu.memory_space<vmem>>, vector<4x512xf32>
    tpu.vector_store %arg8[%c32_51, %c0_52], %51 {strides = array<i32>} : memref<72x512xf32, #tpu.memory_space<vmem>>, vector<4x512xf32>,
    %c511_i32_53 = arith.constant 511 : i32
    %73 = tpu.dynamic_rotate %51 by %c511_i32_53 dim 1 : vector<4x512xf32>, i32 -> vector<4x512xf32>
    %c5_54 = arith.constant 5 : index
    %c0_55 = arith.constant 0 : index
    %74 = vector.load %arg1[%c5_54, %c0_55] : memref<9x512xf32, #tpu.memory_space<vmem>>, vector<1x512xf32>
    %75 = vector.broadcast %74 : vector<1x512xf32> to vector<4x512xf32>
    %76 = arith.mulf %73, %75 : vector<4x512xf32>
    %c40_56 = arith.constant 40 : index
    %c0_57 = arith.constant 0 : index
    %77 = vector.load %arg8[%c40_56, %c0_57] : memref<72x512xf32, #tpu.memory_space<vmem>>, vector<4x512xf32>
    tpu.vector_store %arg8[%c40_56, %c0_57], %76 {strides = array<i32>} : memref<72x512xf32, #tpu.memory_space<vmem>>, vector<4x512xf32>,
    %c497_i32_58 = arith.constant 497 : i32
    %78 = tpu.dynamic_rotate %51 by %c497_i32_58 dim 1 : vector<4x512xf32>, i32 -> vector<4x512xf32>
    %c6_59 = arith.constant 6 : index
    %c0_60 = arith.constant 0 : index
    %79 = vector.load %arg1[%c6_59, %c0_60] : memref<9x512xf32, #tpu.memory_space<vmem>>, vector<1x512xf32>
    %80 = vector.broadcast %79 : vector<1x512xf32> to vector<4x512xf32>
    %81 = arith.mulf %78, %80 : vector<4x512xf32>
    %c48_61 = arith.constant 48 : index
    %c0_62 = arith.constant 0 : index
    %82 = vector.load %arg8[%c48_61, %c0_62] : memref<72x512xf32, #tpu.memory_space<vmem>>, vector<4x512xf32>
    tpu.vector_store %arg8[%c48_61, %c0_62], %81 {strides = array<i32>} : memref<72x512xf32, #tpu.memory_space<vmem>>, vector<4x512xf32>,
    %c496_i32_63 = arith.constant 496 : i32
    %83 = tpu.dynamic_rotate %51 by %c496_i32_63 dim 1 : vector<4x512xf32>, i32 -> vector<4x512xf32>
    %c7_64 = arith.constant 7 : index
    %c0_65 = arith.constant 0 : index
    %84 = vector.load %arg1[%c7_64, %c0_65] : memref<9x512xf32, #tpu.memory_space<vmem>>, vector<1x512xf32>
    %85 = vector.broadcast %84 : vector<1x512xf32> to vector<4x512xf32>
    %86 = arith.mulf %83, %85 : vector<4x512xf32>
    %c56_66 = arith.constant 56 : index
    %c0_67 = arith.constant 0 : index
    %87 = vector.load %arg8[%c56_66, %c0_67] : memref<72x512xf32, #tpu.memory_space<vmem>>, vector<4x512xf32>
    tpu.vector_store %arg8[%c56_66, %c0_67], %86 {strides = array<i32>} : memref<72x512xf32, #tpu.memory_space<vmem>>, vector<4x512xf32>,
    %c495_i32_68 = arith.constant 495 : i32
    %88 = tpu.dynamic_rotate %51 by %c495_i32_68 dim 1 : vector<4x512xf32>, i32 -> vector<4x512xf32>
    %c8_69 = arith.constant 8 : index
    %c0_70 = arith.constant 0 : index
    %89 = vector.load %arg1[%c8_69, %c0_70] : memref<9x512xf32, #tpu.memory_space<vmem>>, vector<1x512xf32>
    %90 = vector.broadcast %89 : vector<1x512xf32> to vector<4x512xf32>
    %91 = arith.mulf %88, %90 : vector<4x512xf32>
    %c64_71 = arith.constant 64 : index
    %c0_72 = arith.constant 0 : index
    %92 = vector.load %arg8[%c64_71, %c0_72] : memref<72x512xf32, #tpu.memory_space<vmem>>, vector<4x512xf32>
    tpu.vector_store %arg8[%c64_71, %c0_72], %91 {strides = array<i32>} : memref<72x512xf32, #tpu.memory_space<vmem>>, vector<4x512xf32>,
    %c0_73 = arith.constant 0 : index
    %c0_74 = arith.constant 0 : index
    %93 = vector.load %arg5[%c0_73, %c0_74] : memref<4x72xf32, #tpu.memory_space<vmem>>, vector<4x72xf32>
    %c0_75 = arith.constant 0 : index
    %c0_76 = arith.constant 0 : index
    %94 = vector.load %arg8[%c0_75, %c0_76] : memref<72x512xf32, #tpu.memory_space<vmem>>, vector<72x512xf32>
    %cst_77 = arith.constant dense<0.000000e+00> : vector<4x512xf32>
    %95 = tpu.matmul %93, %94, %cst_77 {dimension_numbers = #tpu.dot_dimension_numbers<[1], [0], [0], [1], [0, 0, 1, 1], [], []>} : vector<4x72xf32>, vector<72x512xf32>, vector<4x512xf32> -> vector<4x512xf32>
    %c0_78 = arith.constant 0 : index
    %c0_79 = arith.constant 0 : index
    %96 = vector.load %arg6[%c0_78, %c0_79] : memref<4x1xf32, #tpu.memory_space<vmem>>, vector<4x1xf32>
    %97 = vector.broadcast %96 : vector<4x1xf32> to vector<4x512xf32>
    %98 = arith.addf %95, %97 : vector<4x512xf32>
    %99 = arith.addf %2, %98 : vector<4x512xf32>
    %cst_80 = arith.constant 0.000000e+00 : f32
    %100 = vector.broadcast %cst_80 : f32 to vector<4x512xf32>
    %101 = arith.maximumf %99, %100 : vector<4x512xf32>
    %c0_81 = arith.constant 0 : index
    %c0_82 = arith.constant 0 : index
    %102 = vector.load %arg7[%c0_81, %c0_82] : memref<4x512xf32, #tpu.memory_space<vmem>>, vector<4x512xf32>
    tpu.vector_store %arg7[%c0_81, %c0_82], %101 {strides = array<i32>} : memref<4x512xf32, #tpu.memory_space<vmem>>, vector<4x512xf32>,
    return
  }
  func.func @transform_0(%arg0: i32) -> (i32, i32) {
    %c0_i32 = arith.constant 0 : i32
    %c0_i32_0 = arith.constant 0 : i32
    %c0_i32_1 = arith.constant 0 : i32
    return %c0_i32, %c0_i32_0 : i32, i32
  }
  func.func @transform_1(%arg0: i32) -> (i32, i32) {
    %c0_i32 = arith.constant 0 : i32
    %c0_i32_0 = arith.constant 0 : i32
    return %c0_i32, %arg0 : i32, i32
  }
  func.func @transform_2(%arg0: i32) -> (i32, i32) {
    %c0_i32 = arith.constant 0 : i32
    %c0_i32_0 = arith.constant 0 : i32
    %c0_i32_1 = arith.constant 0 : i32
    return %c0_i32, %c0_i32_0 : i32, i32
  }
  func.func @transform_3(%arg0: i32) -> (i32, i32) {
    %c0_i32 = arith.constant 0 : i32
    %c0_i32_0 = arith.constant 0 : i32
    %c0_i32_1 = arith.constant 0 : i32
    return %c0_i32, %c0_i32_0 : i32, i32
  }
  func.func @transform_4(%arg0: i32) -> (i32, i32) {
    %c0_i32 = arith.constant 0 : i32
    %c0_i32_0 = arith.constant 0 : i32
    %c0_i32_1 = arith.constant 0 : i32
    return %c0_i32, %c0_i32_0 : i32, i32
  }
  func.func @transform_5(%arg0: i32) -> (i32, i32) {
    %c0_i32 = arith.constant 0 : i32
    %c0_i32_0 = arith.constant 0 : i32
    %c0_i32_1 = arith.constant 0 : i32
    return %c0_i32, %c0_i32_0 : i32, i32
  }
  func.func @transform_6(%arg0: i32) -> (i32, i32) {
    %c0_i32 = arith.constant 0 : i32
    %c0_i32_0 = arith.constant 0 : i32
    return %c0_i32, %arg0 : i32, i32
  }
}

</mosaic_0001>

<bundles_post_ra>
// kernel: resblock_pallas.1
= control target key start
LH: loop header
LB: loop body
LE: loop exit
PB: predicated region body
PF: predicated region fallthrough
CT: control target
= control target key end

     0   :  { %v1258_v2 = vmov 0.0   ;;  %s1260_s25 = smov 16   ;;  %s1261_s26 = smov 15   ;;  %v1267_v5 = vmov 0   ;;  %v75_v7 = vlaneseq  ;;  %vm467_vm8 = vcmask 588800   ;;  %s1721_s1 = inlined_call_operand.vmem [shape: f32[4,512], index: 1, kind: input, shape index: {}]   ;;  %s1722_s3 = inlined_call_operand.vmem [shape: f32[4,1], index: 3, kind: input, shape index: {}]   ;;  %s1723_s0 = inlined_call_operand.vmem [shape: f32[9,512], index: 0, kind: input, shape index: {}]   ;;  %s1724_s2 = inlined_call_operand.vmem [shape: f32[4,72], index: 2, kind: input, shape index: {}]   ;;  %s1725_s5 = inlined_call_operand.vmem [shape: f32[4,1], index: 5, kind: input, shape index: {}]   ;;  %s1726_s4 = inlined_call_operand.vmem [shape: f32[4,72], index: 4, kind: input, shape index: {}]   ;;  %s1727_s6 = inlined_call_operand.vmem [shape: f32[4,512], index: 6, kind: output, shape index: {}]  }
   0x1   :  { %v1306_v0 = vld [vmem:[%s1721_s1 + $0x8] sm:$0xff]  ;;  %v1311_v1 = vld [vmem:[%s1721_s1] sm:$0xff]  ;;  %23 = vst [vmem:[#allocation2] sm:$0xff] %v1258_v2  ;;  %26 = vst [vmem:[#allocation2 + $0x18] sm:$0xff] %v1258_v2  ;;  %535 = vmatprep.mubr.f32.mxu0 %v1258_v2  ;;  %606 = vmatprep.mubr.f32.mxu1 %v1258_v2  ;;  %s1259_s1 = smov 17   ;;  %s1262_s27 = smov 1  }
   0x2   :  { %24 = vst [vmem:[#allocation2 + $0x8] sm:$0xff] %v1258_v2  ;;  %25 = vst [vmem:[#allocation2 + $0x10] sm:$0xff] %v1258_v2  ;;  %71 = vrot.lane.b32.xlu1 %v1306_v0, %s1259_s1  ;;  %67 = vrot.lane.b32.xlu0 %v1311_v1, %s1259_s1  ;;  %v64_v3 = vcombine.high %v1306_v0, %v1306_v0  ;;  %v63_v4 = vcombine.high %v1311_v1, %v1311_v1  ;;  %s1263_s28 = smov 127   ;;  %s1264_s29 = smov 113   ;;  %v461_v6 = vld [vmem:[%s1722_s3] sm:$0xf] }
   0x3   :  { %27 = vst [vmem:[#allocation2 + $0x20] sm:$0xff] %v1258_v2  ;;  %28 = vst [vmem:[#allocation2 + $0x28] sm:$0xff] %v1258_v2  ;;  %s1265_s30 = smov 112   ;;  %s1266_s7 = smov 111   ;;  %1255 = vset.pattern.permute.xlu0 %v1267_v5  ;;  %v85_v8 = vshrl.u32 %v75_v7, 7  ;;  %v1408_v9 = vand.u32 127, %v75_v7 }
   0x4   :  { %29 = vst [vmem:[#allocation2 + $0x30] sm:$0xff] %v1258_v2  ;;  %30 = vst [vmem:[#allocation2 + $0x38] sm:$0xff] %v1258_v2  ;;  %v82_v14 = vld [vmem:[%s1723_s0] ss:$8 sm:$0xf] }
   0x5   :  { %31 = vst [vmem:[#allocation2 + $0x40] sm:$0xff] %v1258_v2  ;;  %32 = vst [vmem:[#allocation2 + $0x48] sm:$0xff] %v1258_v2  ;;  %v1410_v10 = vsub.s32 0, %v85_v8  ;;  %v1412_v11 = vsub.s32 1, %v85_v8  ;;  %v1414_v12 = vsub.s32 2, %v85_v8  ;;  %v1416_v13 = vsub.s32 3, %v85_v8 }
   0x6   :  { %33 = vst [vmem:[#allocation2 + $0x50] sm:$0xff] %v1258_v2  ;;  %34 = vst [vmem:[#allocation2 + $0x58] sm:$0xff] %v1258_v2  ;;  %73 = vrot.lane.b32.xlu1 %v64_v3, %s1259_s1  ;;  %69 = vrot.lane.b32.xlu0 %v63_v4, %s1259_s1  ;;  %vm77_vm0 = vcmp.lt.s32.totalorder %v1408_v9, 17  ;;  %v1163_v17 = vld [vmem:[%s1723_s0 + $0x1] ss:$8 sm:$0xf] }
   0x7   :  { %35 = vst [vmem:[#allocation2 + $0x60] sm:$0xff] %v1258_v2  ;;  %36 = vst [vmem:[#allocation2 + $0x68] sm:$0xff] %v1258_v2  ;;  %v87_v18 = vrot.slane %v82_v14, %v1410_v10  ;;  %v99_v19 = vrot.slane %v82_v14, %v1416_v13  ;;  %v91_v20 = vrot.slane %v82_v14, %v1412_v11  ;;  %vm120_vm1 = vcmp.lt.s32.totalorder %v1408_v9, 16  ;;  %v1164_v40 = vld [vmem:[%s1723_s0 + $0x2] ss:$8 sm:$0xf] }
   0x8   :  { %37 = vst [vmem:[#allocation2 + $0x70] sm:$0xff] %v1258_v2  ;;  %38 = vst [vmem:[#allocation2 + $0x78] sm:$0xff] %v1258_v2  ;;  %v95_v21 = vrot.slane %v82_v14, %v1414_v12  ;;  %v135_v24 = vrot.slane %v1163_v17, %v1412_v11  ;;  %v131_v37 = vrot.slane %v1163_v17, %v1410_v10  ;;  %vm164_vm2 = vcmp.lt.s32.totalorder %v1408_v9, 15  ;;  %v1165_v59 = vld [vmem:[%s1723_s0 + $0x3] ss:$8 sm:$0xf] }
   0x9   :  { %39 = vst [vmem:[#allocation2 + $0x80] sm:$0xff] %v1258_v2  ;;  %40 = vst [vmem:[#allocation2 + $0x88] sm:$0xff] %v1258_v2  ;;  %v139_v38 = vrot.slane %v1163_v17, %v1414_v12  ;;  %v143_v39 = vrot.slane %v1163_v17, %v1416_v13  ;;  %v179_v49 = vrot.slane %v1164_v40, %v1412_v11  ;;  %vm208_vm3 = vcmp.lt.s32.totalorder %v1408_v9, 1 }
   0xa   :  { %41 = vst [vmem:[#allocation2 + $0x90] sm:$0xff] %v1258_v2  ;;  %42 = vst [vmem:[#allocation2 + $0x98] sm:$0xff] %v1258_v2  ;;  %114 = vrot.lane.b32.xlu1 %v63_v4, %s1260_s25  ;;  %112 = vrot.lane.b32.xlu0 %v1311_v1, %s1260_s25  ;;  %v175_v54 = vrot.slane %v1164_v40, %v1410_v10  ;;  %v183_v55 = vrot.slane %v1164_v40, %v1414_v12  ;;  %vm256_vm4 = vcmp.lt.s32.totalorder %v1408_v9, 127 }
   0xb   :  { %43 = vst [vmem:[#allocation2 + $0xa0] sm:$0xff] %v1258_v2  ;;  %44 = vst [vmem:[#allocation2 + $0xa8] sm:$0xff] %v1258_v2  ;;  %v187_v56 = vrot.slane %v1164_v40, %v1416_v13  ;;  %v223_v8 = vrot.slane %v1165_v59, %v1412_v11  ;;  %vm300_vm5 = vcmp.lt.s32.totalorder %v1408_v9, 113  ;;  %vm344_vm6 = vcmp.lt.s32.totalorder %v1408_v9, 112 }
   0xc   :  { %45 = vst [vmem:[#allocation2 + $0xb0] sm:$0xff] %v1258_v2  ;;  %46 = vst [vmem:[#allocation2 + $0xb8] sm:$0xff] %v1258_v2  ;;  %vm388_vm7 = vcmp.lt.s32.totalorder %v1408_v9, 111  ;;  %v957_v9 = vld [vmem:[%s1726_s4] sm:$0xf] }
   0xd   :  { %47 = vst [vmem:[#allocation2 + $0xc0] sm:$0xff] %v1258_v2  ;;  %48 = vst [vmem:[#allocation2 + $0xc8] sm:$0xff] %v1258_v2 }
   0xe   :  { %49 = vst [vmem:[#allocation2 + $0xd0] sm:$0xff] %v1258_v2  ;;  %50 = vst [vmem:[#allocation2 + $0xd8] sm:$0xff] %v1258_v2  ;;  %118 = vrot.lane.b32.xlu1 %v64_v3, %s1260_s25  ;;  %116 = vrot.lane.b32.xlu0 %v1306_v0, %s1260_s25 }
   0xf   :  { %51 = vst [vmem:[#allocation2 + $0xe0] sm:$0xff] %v1258_v2  ;;  %52 = vst [vmem:[#allocation2 + $0xe8] sm:$0xff] %v1258_v2 }
  0x10   :  { %53 = vst [vmem:[#allocation2 + $0xf0] sm:$0xff] %v1258_v2  ;;  %54 = vst [vmem:[#allocation2 + $0xf8] sm:$0xff] %v1258_v2 }
  0x11   :  { %55 = vst [vmem:[#allocation2 + $0x100] sm:$0xff] %v1258_v2  ;;  %56 = vst [vmem:[#allocation2 + $0x108] sm:$0xff] %v1258_v2 }
  0x12   :  { %57 = vst [vmem:[#allocation2 + $0x110] sm:$0xff] %v1258_v2  ;;  %58 = vst [vmem:[#allocation2 + $0x118] sm:$0xff] %v1258_v2  ;;  %158 = vrot.lane.b32.xlu1 %v63_v4, %s1261_s26  ;;  %156 = vrot.lane.b32.xlu0 %v1311_v1, %s1261_s26 }
  0x13   :  { %244 = vst [vmem:[#allocation2 + $0x80] sm:$0xf] %v1311_v1  ;;  %246 = vst [vmem:[#allocation2 + $0x90] sm:$0xf] %v1306_v0 }
  0x14   :  { %245 = vst [vmem:[#allocation2 + $0x88] sm:$0xf] %v63_v4  ;;  %247 = vst [vmem:[#allocation2 + $0x98] sm:$0xf] %v64_v3 }
  0x16   :  { %162 = vrot.lane.b32.xlu1 %v64_v3, %s1261_s26  ;;  %160 = vrot.lane.b32.xlu0 %v1306_v0, %s1261_s26 }
  0x1a   :  { %202 = vrot.lane.b32.xlu1 %v63_v4, %s1262_s27  ;;  %200 = vrot.lane.b32.xlu0 %v1311_v1, %s1262_s27 }
  0x1e   :  { %206 = vrot.lane.b32.xlu1 %v64_v3, %s1262_s27  ;;  %204 = vrot.lane.b32.xlu0 %v1306_v0, %s1262_s27 }
  0x22   :  { %250 = vrot.lane.b32.xlu1 %v63_v4, %s1263_s28  ;;  %248 = vrot.lane.b32.xlu0 %v1311_v1, %s1263_s28 }
  0x26   :  { %254 = vrot.lane.b32.xlu1 %v64_v3, %s1263_s28  ;;  %252 = vrot.lane.b32.xlu0 %v1306_v0, %s1263_s28 }
  0x2a   :  { %294 = vrot.lane.b32.xlu1 %v63_v4, %s1264_s29  ;;  %292 = vrot.lane.b32.xlu0 %v1311_v1, %s1264_s29 }
  0x2e   :  { %298 = vrot.lane.b32.xlu1 %v64_v3, %s1264_s29  ;;  %296 = vrot.lane.b32.xlu0 %v1306_v0, %s1264_s29 }
  0x32   :  { %338 = vrot.lane.b32.xlu1 %v63_v4, %s1265_s30  ;;  %336 = vrot.lane.b32.xlu0 %v1311_v1, %s1265_s30 }
  0x36   :  { %342 = vrot.lane.b32.xlu1 %v64_v3, %s1265_s30  ;;  %340 = vrot.lane.b32.xlu0 %v1306_v0, %s1265_s30 }
  0x3a   :  { %382 = vrot.lane.b32.xlu1 %v63_v4, %s1266_s7  ;;  %380 = vrot.lane.b32.xlu0 %v1311_v1, %s1266_s7 }
  0x3e   :  { %386 = vrot.lane.b32.xlu1 %v64_v3, %s1266_s7  ;;  %384 = vrot.lane.b32.xlu0 %v1306_v0, %s1266_s7 }
  0x42   :  { %464 = vperm.xlu0 %1255, %v461_v6  }
  0x74   :  { %v72_v15 = vpop.permute.xlu1 %71  ;;  %v68_v16 = vpop.permute.xlu0 %67 }
  0x78   :  { %v74_v22 = vpop.permute.xlu1 %73  ;;  %v70_v23 = vpop.permute.xlu0 %69 }
  0x79   :  { %v78_v25 = vsel %vm77_vm0, %v72_v15, %v74_v22  ;;  %v81_v26 = vsel %vm77_vm0, %v74_v22, %v68_v16  ;;  %v79_v27 = vsel %vm77_vm0, %v70_v23, %v72_v15  ;;  %v80_v28 = vsel %vm77_vm0, %v68_v16, %v70_v23 }
  0x7a   :  { %v104_v29 = vmul.f32 %v87_v18, %v81_v26  ;;  %v107_v30 = vmul.f32 %v99_v19, %v78_v25  ;;  %v105_v31 = vmul.f32 %v91_v20, %v80_v28  ;;  %v106_v32 = vmul.f32 %v95_v21, %v79_v27 }
  0x7b   :  { %v219_v26 = vrot.slane %v1165_v59, %v1410_v10  ;;  %v227_v28 = vrot.slane %v1165_v59, %v1414_v12 }
  0x7c   :  { %108 = vst [vmem:[#allocation2] sm:$0xf] %v104_v29  ;;  %111 = vst [vmem:[#allocation2 + $0x18] sm:$0xf] %v107_v30  ;;  %v115_v33 = vpop.permute.xlu1 %114  ;;  %v113_v34 = vpop.permute.xlu0 %112  ;;  %v231_v29 = vrot.slane %v1165_v59, %v1416_v13 }
  0x7d   :  { %109 = vst [vmem:[#allocation2 + $0x8] sm:$0xf] %v105_v31  ;;  %110 = vst [vmem:[#allocation2 + $0x10] sm:$0xf] %v106_v32  ;;  %v123_v35 = vsel %vm120_vm1, %v113_v34, %v115_v33 }
  0x7e   :  { %v149_v36 = vmul.f32 %v135_v24, %v123_v35  ;;  %v1166_v30 = vld [vmem:[%s1723_s0 + $0x5] ss:$8 sm:$0xf] }
  0x80   :  { %153 = vst [vmem:[#allocation2 + $0x28] sm:$0xf] %v149_v36  ;;  %v119_v41 = vpop.permute.xlu1 %118  ;;  %v117_v42 = vpop.permute.xlu0 %116 }
  0x81   :  { %v124_v43 = vsel %vm120_vm1, %v119_v41, %v113_v34  ;;  %v121_v44 = vsel %vm120_vm1, %v117_v42, %v119_v41  ;;  %v122_v45 = vsel %vm120_vm1, %v115_v33, %v117_v42 }
  0x82   :  { %v148_v46 = vmul.f32 %v131_v37, %v124_v43  ;;  %v150_v47 = vmul.f32 %v139_v38, %v122_v45  ;;  %v151_v48 = vmul.f32 %v143_v39, %v121_v44  ;;  %v267_v39 = vrot.slane %v1166_v30, %v1410_v10 }
  0x83   :  { %v425_v14 = vld [vmem:[#allocation2] sm:$0xff]  ;;  %v428_v15 = vld [vmem:[#allocation2 + $0x18] sm:$0xff]  ;;  %v279_v44 = vrot.slane %v1166_v30, %v1416_v13  ;;  %v271_v45 = vrot.slane %v1166_v30, %v1412_v11 }
  0x84   :  { %152 = vst [vmem:[#allocation2 + $0x20] sm:$0xf] %v148_v46  ;;  %154 = vst [vmem:[#allocation2 + $0x30] sm:$0xf] %v150_v47  ;;  %v159_v50 = vpop.permute.xlu1 %158  ;;  %v157_v51 = vpop.permute.xlu0 %156  ;;  %v426_v57 = vld [vmem:[#allocation2 + $0x8] sm:$0xff]  ;;  %v427_v16 = vld [vmem:[#allocation2 + $0x10] sm:$0xff]  ;;  %v275_v46 = vrot.slane %v1166_v30, %v1414_v12 }
  0x85   :  { %155 = vst [vmem:[#allocation2 + $0x38] sm:$0xf] %v151_v48  ;;  %v167_v52 = vsel %vm164_vm2, %v157_v51, %v159_v50 }
  0x86   :  { %v193_v53 = vmul.f32 %v179_v49, %v167_v52  ;;  %v1167_v49 = vld [vmem:[%s1723_s0 + $0x6] ss:$8 sm:$0xf] }
  0x87   :  { %v430_v58 = vld [vmem:[#allocation2 + $0x28] sm:$0xff]  ;;  %v311_v59 = vrot.slane %v1167_v49, %v1410_v10 }
  0x88   :  { %197 = vst [vmem:[#allocation2 + $0x48] sm:$0xf] %v193_v53  ;;  %v163_v60 = vpop.permute.xlu1 %162  ;;  %v161_v61 = vpop.permute.xlu0 %160  ;;  %v1181_v62 = vpack.c.bf16 %v430_v58, %v426_v57 }
  0x89   :  { %v168_v63 = vsel %vm164_vm2, %v163_v60, %v157_v51  ;;  %v165_v3 = vsel %vm164_vm2, %v161_v61, %v163_v60  ;;  %v166_v4 = vsel %vm164_vm2, %v159_v50, %v161_v61 }
  0x8a   :  { %v192_v5 = vmul.f32 %v175_v54, %v168_v63  ;;  %v194_v6 = vmul.f32 %v183_v55, %v166_v4  ;;  %v195_v7 = vmul.f32 %v187_v56, %v165_v3  ;;  %1182 = vmatprep.subr.bf16.mxu0 %v1181_v62 }
  0x8b   :  { %v429_v17 = vld [vmem:[#allocation2 + $0x20] sm:$0xff]  ;;  %v431_v19 = vld [vmem:[#allocation2 + $0x30] sm:$0xff] }
  0x8c   :  { %v432_v18 = vld [vmem:[#allocation2 + $0x38] sm:$0xff]  ;;  %196 = vst [vmem:[#allocation2 + $0x40] sm:$0xf] %v192_v5  ;;  %198 = vst [vmem:[#allocation2 + $0x50] sm:$0xf] %v194_v6  ;;  %v203_v20 = vpop.permute.xlu1 %202  ;;  %v201_v21 = vpop.permute.xlu0 %200  ;;  %v1183_v22 = vpack.c.bf16 %v429_v17, %v425_v14  ;;  %v1199_v24 = vpack.c.bf16 %v431_v19, %v427_v16  ;;  %v323_v16 = vrot.slane %v1167_v49, %v1416_v13 }
  0x8d   :  { %199 = vst [vmem:[#allocation2 + $0x58] sm:$0xf] %v195_v7  ;;  %v1197_v23 = vpack.c.bf16 %v432_v18, %v428_v15  ;;  %v211_v25 = vsel %vm208_vm3, %v201_v21, %v203_v20  ;;  %v315_v18 = vrot.slane %v1167_v49, %v1412_v11  ;;  %v319_v19 = vrot.slane %v1167_v49, %v1414_v12  ;;  %v1169_v49 = vld [vmem:[%s1723_s0 + $0x20] ss:$8 sm:$0xf] }
  0x8e   :  { %v237_v27 = vmul.f32 %v223_v8, %v211_v25  ;;  %1184 = vmatpush1.bf16.msra.mxu0 %v1183_v22 }
  0x8f   :  { %1198 = vmatprep.subr.bf16.mxu1 %v1197_v23  ;;  %v434_v47 = vld [vmem:[#allocation2 + $0x48] sm:$0xff] }
  0x90   :  { %1200 = vmatpush1.bf16.msra.mxu1 %v1199_v24  ;;  %241 = vst [vmem:[#allocation2 + $0x68] sm:$0xf] %v237_v27  ;;  %v207_v31 = vpop.permute.xlu1 %206  ;;  %v205_v32 = vpop.permute.xlu0 %204  ;;  %v444_v27 = vld [vmem:[#allocation2 + $0x98] sm:$0xff] }
  0x91   :  { %v212_v33 = vsel %vm208_vm3, %v207_v31, %v201_v21  ;;  %v209_v34 = vsel %vm208_vm3, %v205_v32, %v207_v31  ;;  %v210_v35 = vsel %vm208_vm3, %v203_v20, %v205_v32  ;;  %v1168_v20 = vld [vmem:[%s1723_s0 + $0x7] ss:$8 sm:$0xf] }
  0x92   :  { %v236_v36 = vmul.f32 %v219_v26, %v212_v33  ;;  %v238_v37 = vmul.f32 %v227_v28, %v210_v35  ;;  %v239_v38 = vmul.f32 %v231_v29, %v209_v34  ;;  %v442_v26 = vld [vmem:[#allocation2 + $0x88] sm:$0xff]  ;;  %v443_v28 = vld [vmem:[#allocation2 + $0x90] sm:$0xff]  ;;  %v355_v32 = vrot.slane %v1168_v20, %v1410_v10  ;;  %v441_v33 = vld [vmem:[#allocation2 + $0x80] sm:$0xff] }
  0x93   :  { %v433_v60 = vld [vmem:[#allocation2 + $0x40] sm:$0xff]  ;;  %v435_v62 = vld [vmem:[#allocation2 + $0x50] sm:$0xff] }
  0x94   :  { %240 = vst [vmem:[#allocation2 + $0x60] sm:$0xf] %v236_v36  ;;  %242 = vst [vmem:[#allocation2 + $0x70] sm:$0xf] %v238_v37  ;;  %v251_v40 = vpop.permute.xlu1 %250  ;;  %v249_v41 = vpop.permute.xlu0 %248  ;;  %v436_v61 = vld [vmem:[#allocation2 + $0x58] sm:$0xff] }
  0x95   :  { %243 = vst [vmem:[#allocation2 + $0x78] sm:$0xf] %v239_v38  ;;  %v259_v42 = vsel %vm256_vm4, %v249_v41, %v251_v40 }
  0x96   :  { %v284_v43 = vmul.f32 %v267_v39, %v259_v42 }
  0x97   :  { %v438_v48 = vld [vmem:[#allocation2 + $0x68] sm:$0xff] }
  0x98   :  { %288 = vst [vmem:[#allocation2 + $0xa0] sm:$0xf] %v284_v43  ;;  %v255_v50 = vpop.permute.xlu1 %254  ;;  %v253_v51 = vpop.permute.xlu0 %252  ;;  %v1185_v52 = vpack.c.bf16 %v438_v48, %v434_v47  ;;  %v359_v47 = vrot.slane %v1168_v20, %v1412_v11  ;;  %v363_v48 = vrot.slane %v1168_v20, %v1414_v12 }
  0x99   :  { %v260_v53 = vsel %vm256_vm4, %v255_v50, %v249_v41  ;;  %v257_v54 = vsel %vm256_vm4, %v253_v51, %v255_v50  ;;  %v258_v55 = vsel %vm256_vm4, %v251_v40, %v253_v51 }
  0x9a   :  { %v287_v56 = vmul.f32 %v279_v44, %v260_v53  ;;  %v285_v57 = vmul.f32 %v271_v45, %v258_v55  ;;  %v286_v58 = vmul.f32 %v275_v46, %v257_v54  ;;  %1186 = vmatprep.subr.bf16.mxu0 %v1185_v52  ;;  %v367_v45 = vrot.slane %v1168_v20, %v1416_v13 }
  0x9b   :  { %v437_v63 = vld [vmem:[#allocation2 + $0x60] sm:$0xff]  ;;  %v439_v4 = vld [vmem:[#allocation2 + $0x70] sm:$0xff] }
  0x9c   :  { %v440_v3 = vld [vmem:[#allocation2 + $0x78] sm:$0xff]  ;;  %291 = vst [vmem:[#allocation2 + $0xb8] sm:$0xf] %v287_v56  ;;  %289 = vst [vmem:[#allocation2 + $0xa8] sm:$0xf] %v285_v57  ;;  %v295_v5 = vpop.permute.xlu1 %294  ;;  %v293_v6 = vpop.permute.xlu0 %292  ;;  %v1187_v7 = vpack.c.bf16 %v437_v63, %v433_v60  ;;  %v1203_v14 = vpack.c.bf16 %v439_v4, %v435_v62  ;;  %v411_v63 = vrot.slane %v1169_v49, %v1416_v13 }
  0x9d   :  { %290 = vst [vmem:[#allocation2 + $0xb0] sm:$0xf] %v286_v58  ;;  %v1201_v8 = vpack.c.bf16 %v440_v3, %v436_v61  ;;  %v303_v15 = vsel %vm300_vm5, %v293_v6, %v295_v5  ;;  %v399_v58 = vrot.slane %v1169_v49, %v1410_v10  ;;  %v403_v3 = vrot.slane %v1169_v49, %v1412_v11 }
  0x9e   :  { %v328_v17 = vmul.f32 %v311_v59, %v303_v15  ;;  %1188 = vmatpush1.bf16.msra.mxu0 %v1187_v7  ;;  %v407_v4 = vrot.slane %v1169_v49, %v1414_v12 }
  0x9f   :  { %1202 = vmatprep.subr.bf16.mxu1 %v1201_v8  ;;  %v445_v34 = vld [vmem:[#allocation2 + $0xa0] sm:$0xff] }
  0xa0   :  { %1204 = vmatpush1.bf16.msra.mxu1 %v1203_v14  ;;  %332 = vst [vmem:[#allocation2 + $0xc0] sm:$0xf] %v328_v17  ;;  %v299_v21 = vpop.permute.xlu1 %298  ;;  %v297_v22 = vpop.permute.xlu0 %296  ;;  %v1191_v44 = vpack.c.bf16 %v445_v34, %v441_v33 }
  0xa1   :  { %v304_v23 = vsel %vm300_vm5, %v299_v21, %v293_v6  ;;  %v301_v24 = vsel %vm300_vm5, %v297_v22, %v299_v21  ;;  %v302_v25 = vsel %vm300_vm5, %v295_v5, %v297_v22 }
  0xa2   :  { %v331_v29 = vmul.f32 %v323_v16, %v304_v23  ;;  %v329_v30 = vmul.f32 %v315_v18, %v302_v25  ;;  %v330_v31 = vmul.f32 %v319_v19, %v301_v24 }
  0xa3   :  { %v446_v35 = vld [vmem:[#allocation2 + $0xa8] sm:$0xff]  ;;  %v448_v36 = vld [vmem:[#allocation2 + $0xb8] sm:$0xff] }
  0xa4   :  { %v447_v37 = vld [vmem:[#allocation2 + $0xb0] sm:$0xff]  ;;  %335 = vst [vmem:[#allocation2 + $0xd8] sm:$0xf] %v331_v29  ;;  %333 = vst [vmem:[#allocation2 + $0xc8] sm:$0xf] %v329_v30  ;;  %v339_v38 = vpop.permute.xlu1 %338  ;;  %v337_v39 = vpop.permute.xlu0 %336  ;;  %v1189_v40 = vpack.c.bf16 %v446_v35, %v442_v26  ;;  %v1205_v41 = vpack.c.bf16 %v448_v36, %v444_v27 }
  0xa5   :  { %334 = vst [vmem:[#allocation2 + $0xd0] sm:$0xf] %v330_v31  ;;  %v1207_v42 = vpack.c.bf16 %v447_v37, %v443_v28  ;;  %v347_v43 = vsel %vm344_vm6, %v337_v39, %v339_v38  ;;  %v424_v30 = vld [vmem:[%s1724_s2] sm:$0xf] }
  0xa6   :  { %v372_v46 = vmul.f32 %v355_v32, %v347_v43  ;;  %1190 = vmatprep.subr.bf16.mxu0 %v1189_v40  ;;  %1206 = vmatprep.subr.bf16.mxu1 %v1205_v41 }
  0xa7   :  { %1192 = vmatpush1.bf16.msra.mxu0 %v1191_v44  ;;  %1208 = vmatpush1.bf16.msra.mxu1 %v1207_v42  ;;  %v449_v27 = vld [vmem:[#allocation2 + $0xc0] sm:$0xff] }
  0xa8   :  { %376 = vst [vmem:[#allocation2 + $0xe0] sm:$0xf] %v372_v46  ;;  %v343_v50 = vpop.permute.xlu1 %342  ;;  %v341_v51 = vpop.permute.xlu0 %340 }
  0xa9   :  { %v348_v52 = vsel %vm344_vm6, %v343_v50, %v337_v39  ;;  %v345_v53 = vsel %vm344_vm6, %v341_v51, %v343_v50  ;;  %v346_v54 = vsel %vm344_vm6, %v339_v38, %v341_v51 }
  0xaa   :  { %v375_v55 = vmul.f32 %v367_v45, %v348_v52  ;;  %v373_v56 = vmul.f32 %v359_v47, %v346_v54  ;;  %v374_v57 = vmul.f32 %v363_v48, %v345_v53  ;;  %v629_v48 = vld [vmem:[%s1723_s0] ss:$8 sm:$0xf] }
  0xab   :  { %v450_v15 = vld [vmem:[#allocation2 + $0xc8] sm:$0xff]  ;;  %v452_v19 = vld [vmem:[#allocation2 + $0xd8] sm:$0xff]  ;;  %v638_v51 = vrot.slane %v629_v48, %v1412_v11  ;;  %v642_v52 = vrot.slane %v629_v48, %v1414_v12 }
  0xac   :  { %379 = vst [vmem:[#allocation2 + $0xf8] sm:$0xf] %v375_v55  ;;  %377 = vst [vmem:[#allocation2 + $0xe8] sm:$0xf] %v373_v56  ;;  %v383_v59 = vpop.permute.xlu1 %382  ;;  %v381_v60 = vpop.permute.xlu0 %380  ;;  %v451_v21 = vld [vmem:[#allocation2 + $0xd0] sm:$0xff] }
  0xad   :  { %378 = vst [vmem:[#allocation2 + $0xf0] sm:$0xf] %v374_v57  ;;  %v391_v61 = vsel %vm388_vm7, %v381_v60, %v383_v59 }
  0xae   :  { %v416_v62 = vmul.f32 %v399_v58, %v391_v61  ;;  %v1172_v61 = vld [vmem:[%s1723_s0 + $0x1] ss:$8 sm:$0xf] }
  0xaf   :  { %v453_v20 = vld [vmem:[#allocation2 + $0xe0] sm:$0xff] }
  0xb0   :  { %420 = vst [vmem:[#allocation2 + $0x100] sm:$0xf] %v416_v62  ;;  %v387_v5 = vpop.permute.xlu1 %386  ;;  %v385_v6 = vpop.permute.xlu0 %384  ;;  %v1195_v29 = vpack.c.bf16 %v453_v20, %v449_v27  ;;  %v676_v20 = vrot.slane %v1172_v61, %v1410_v10 }
  0xb1   :  { %v392_v7 = vsel %vm388_vm7, %v387_v5, %v381_v60  ;;  %v389_v8 = vsel %vm388_vm7, %v385_v6, %v387_v5  ;;  %v390_v14 = vsel %vm388_vm7, %v383_v59, %v385_v6  ;;  %v634_v59 = vrot.slane %v629_v48, %v1410_v10 }
  0xb2   :  { %v419_v16 = vmul.f32 %v411_v63, %v392_v7  ;;  %v417_v17 = vmul.f32 %v403_v3, %v390_v14  ;;  %v418_v18 = vmul.f32 %v407_v4, %v389_v8  ;;  %v646_v60 = vrot.slane %v629_v48, %v1416_v13 }
  0xb3   :  { %v454_v22 = vld [vmem:[#allocation2 + $0xe8] sm:$0xff]  ;;  %v456_v23 = vld [vmem:[#allocation2 + $0xf8] sm:$0xff]  ;;  %v680_v7 = vrot.slane %v1172_v61, %v1412_v11  ;;  %v684_v8 = vrot.slane %v1172_v61, %v1414_v12 }
  0xb4   :  { %v455_v24 = vld [vmem:[#allocation2 + $0xf0] sm:$0xff]  ;;  %423 = vst [vmem:[#allocation2 + $0x118] sm:$0xf] %v419_v16  ;;  %421 = vst [vmem:[#allocation2 + $0x108] sm:$0xf] %v417_v17  ;;  %v1193_v25 = vpack.c.bf16 %v454_v22, %v450_v15  ;;  %v1209_v26 = vpack.c.bf16 %v456_v23, %v452_v19 }
  0xb5   :  { %422 = vst [vmem:[#allocation2 + $0x110] sm:$0xf] %v418_v18  ;;  %v1211_v28 = vpack.c.bf16 %v455_v24, %v451_v21  ;;  %v688_v21 = vrot.slane %v1172_v61, %v1416_v13  ;;  %v1173_v22 = vld [vmem:[%s1723_s0 + $0x2] ss:$8 sm:$0xf] }
  0xb6   :  { %1194 = vmatprep.subr.bf16.mxu0 %v1193_v25  ;;  %1210 = vmatprep.subr.bf16.mxu1 %v1209_v26 }
  0xb7   :  { %1196 = vmatpush1.bf16.msra.mxu0 %v1195_v29  ;;  %1212 = vmatpush1.bf16.msra.mxu1 %v1211_v28  ;;  %v457_v34 = vld [vmem:[#allocation2 + $0x100] sm:$0xff]  ;;  %v722_v29 = vrot.slane %v1173_v22, %v1412_v11 }
  0xbb   :  { %v458_v31 = vld [vmem:[#allocation2 + $0x108] sm:$0xff]  ;;  %v460_v32 = vld [vmem:[#allocation2 + $0x118] sm:$0xff] }
  0xbc   :  { %v459_v33 = vld [vmem:[#allocation2 + $0x110] sm:$0xff]  ;;  %487 = vmatprep.subr.mxu0 %v458_v31  ;;  %558 = vmatprep.subr.mxu1 %v460_v32 }
  0xbd   :  { %488 = vmatpush1.msra.mxu0 %v457_v34  ;;  %559 = vmatpush1.msra.mxu1 %v459_v33 }
  0xbe   :  { %1170 = vmatmul.mubr.msk.f32.vlgmr.msra.gmra.mrb[0].mxu0 %vm467_vm8, %v424_v30  ;;  %1171 = vmatmul.mubr.msk.f32.vlgmr.msra.gmra.mrb[0].mxu1 %vm467_vm8, %v424_v30  ;;  %v726_v30 = vrot.slane %v1173_v22, %v1414_v12 }
  0xbf   :  { %1067 = vmatprep.mubr.f32.mxu0 %v1258_v2  ;;  %1138 = vmatprep.mubr.f32.mxu1 %v1258_v2  ;;  %v994_v2 = vld [vmem:[%s1725_s5] sm:$0xf] }
  0xc1   :  { %v465_v35 = vpop.permute.xlu0 %464 }
 0x191   :  { %v537_v36 = vpop.f32.mrb[0].mxu0  ;;  %v608_v37 = vpop.f32.mrb[0].mxu1 }
 0x192   :  { %v538_v38 = vadd.f32 %v537_v36, %v465_v35  ;;  %v609_v39 = vadd.f32 %v608_v37, %v465_v35  ;;  %v539_v40 = vpop.f32.mrb[1].mxu0  ;;  %v610_v41 = vpop.f32.mrb[1].mxu1  ;;  %v718_v37 = vrot.slane %v1173_v22, %v1410_v10 }
 0x193   :  { %v540_v42 = vadd.f32 %v539_v40, %v465_v35  ;;  %v611_v43 = vadd.f32 %v610_v41, %v465_v35  ;;  %v1174_v41 = vld [vmem:[%s1723_s0 + $0x3] ss:$8 sm:$0xf] }
 0x194   :  { %v613_v44 = vmax.f32 %v538_v38, 0.0  ;;  %v615_v45 = vmax.f32 %v609_v39, 0.0  ;;  %v730_v38 = vrot.slane %v1173_v22, %v1416_v13  ;;  %v764_v48 = vrot.slane %v1174_v41, %v1412_v11 }
 0x195   :  { %v614_v46 = vmax.f32 %v540_v42, 0.0  ;;  %v616_v47 = vmax.f32 %v611_v43, 0.0 }
 0x196   :  { %785 = vst [vmem:[#allocation2 + $0x80] sm:$0xf] %v613_v44  ;;  %787 = vst [vmem:[#allocation2 + $0x90] sm:$0xf] %v615_v45  ;;  %621 = vrot.lane.b32.xlu0 %v615_v45, %s1259_s1  ;;  %617 = vrot.lane.b32.xlu1 %v613_v44, %s1259_s1 }
 0x197   :  { %786 = vst [vmem:[#allocation2 + $0x88] sm:$0xf] %v614_v46  ;;  %788 = vst [vmem:[#allocation2 + $0x98] sm:$0xf] %v616_v47 }
 0x19a   :  { %659 = vrot.lane.b32.xlu0 %v613_v44, %s1260_s25  ;;  %619 = vrot.lane.b32.xlu1 %v614_v46, %s1259_s1 }
 0x19e   :  { %663 = vrot.lane.b32.xlu0 %v615_v45, %s1260_s25  ;;  %623 = vrot.lane.b32.xlu1 %v616_v47, %s1259_s1 }
 0x1a2   :  { %701 = vrot.lane.b32.xlu0 %v613_v44, %s1261_s26  ;;  %661 = vrot.lane.b32.xlu1 %v614_v46, %s1260_s25 }
 0x1a6   :  { %705 = vrot.lane.b32.xlu0 %v615_v45, %s1261_s26  ;;  %665 = vrot.lane.b32.xlu1 %v616_v47, %s1260_s25 }
 0x1aa   :  { %743 = vrot.lane.b32.xlu0 %v613_v44, %s1262_s27  ;;  %703 = vrot.lane.b32.xlu1 %v614_v46, %s1261_s26 }
 0x1ae   :  { %747 = vrot.lane.b32.xlu0 %v615_v45, %s1262_s27  ;;  %707 = vrot.lane.b32.xlu1 %v616_v47, %s1261_s26 }
 0x1b2   :  { %789 = vrot.lane.b32.xlu0 %v613_v44, %s1263_s28  ;;  %745 = vrot.lane.b32.xlu1 %v614_v46, %s1262_s27 }
 0x1b6   :  { %793 = vrot.lane.b32.xlu0 %v615_v45, %s1263_s28  ;;  %749 = vrot.lane.b32.xlu1 %v616_v47, %s1262_s27 }
 0x1ba   :  { %831 = vrot.lane.b32.xlu0 %v613_v44, %s1264_s29  ;;  %791 = vrot.lane.b32.xlu1 %v614_v46, %s1263_s28 }
 0x1be   :  { %835 = vrot.lane.b32.xlu0 %v615_v45, %s1264_s29  ;;  %795 = vrot.lane.b32.xlu1 %v616_v47, %s1263_s28 }
 0x1c2   :  { %873 = vrot.lane.b32.xlu0 %v613_v44, %s1265_s30  ;;  %833 = vrot.lane.b32.xlu1 %v614_v46, %s1264_s29 }
 0x1c6   :  { %877 = vrot.lane.b32.xlu0 %v615_v45, %s1265_s30  ;;  %837 = vrot.lane.b32.xlu1 %v616_v47, %s1264_s29 }
 0x1ca   :  { %915 = vrot.lane.b32.xlu0 %v613_v44, %s1266_s7  ;;  %875 = vrot.lane.b32.xlu1 %v614_v46, %s1265_s30 }
 0x1ce   :  { %919 = vrot.lane.b32.xlu0 %v615_v45, %s1266_s7  ;;  %879 = vrot.lane.b32.xlu1 %v616_v47, %s1265_s30 }
 0x1d2   :  { %997 = vperm.xlu0 %1255, %v994_v2   ;;  %917 = vrot.lane.b32.xlu1 %v614_v46, %s1266_s7 }
 0x1d6   :  { %921 = vrot.lane.b32.xlu1 %v616_v47, %s1266_s7 }
 0x208   :  { %v622_v49 = vpop.permute.xlu0 %621  ;;  %v618_v50 = vpop.permute.xlu1 %617 }
 0x20c   :  { %v660_v53 = vpop.permute.xlu0 %659  ;;  %v620_v54 = vpop.permute.xlu1 %619 }
 0x20d   :  { %v626_v55 = vsel %vm77_vm0, %v620_v54, %v622_v49  ;;  %v627_v56 = vsel %vm77_vm0, %v618_v50, %v620_v54 }
 0x20e   :  { %v652_v57 = vmul.f32 %v638_v51, %v627_v56  ;;  %v653_v58 = vmul.f32 %v642_v52, %v626_v55 }
 0x210   :  { %656 = vst [vmem:[#allocation2 + $0x8] sm:$0xf] %v652_v57  ;;  %657 = vst [vmem:[#allocation2 + $0x10] sm:$0xf] %v653_v58  ;;  %v664_v62 = vpop.permute.xlu0 %663  ;;  %v624_v63 = vpop.permute.xlu1 %623 }
 0x211   :  { %v625_v3 = vsel %vm77_vm0, %v622_v49, %v624_v63  ;;  %v628_v4 = vsel %vm77_vm0, %v624_v63, %v618_v50  ;;  %v768_v49 = vrot.slane %v1174_v41, %v1414_v12  ;;  %v760_v63 = vrot.slane %v1174_v41, %v1410_v10 }
 0x212   :  { %v651_v5 = vmul.f32 %v634_v59, %v628_v4  ;;  %v654_v6 = vmul.f32 %v646_v60, %v625_v3 }
 0x214   :  { %655 = vst [vmem:[#allocation2] sm:$0xf] %v651_v5  ;;  %658 = vst [vmem:[#allocation2 + $0x18] sm:$0xf] %v654_v6  ;;  %v702_v14 = vpop.permute.xlu0 %701  ;;  %v662_v15 = vpop.permute.xlu1 %661  ;;  %v772_v5 = vrot.slane %v1174_v41, %v1416_v13 }
 0x215   :  { %v668_v16 = vsel %vm120_vm1, %v662_v15, %v664_v62  ;;  %v669_v17 = vsel %vm120_vm1, %v660_v53, %v662_v15  ;;  %v1175_v6 = vld [vmem:[%s1723_s0 + $0x5] ss:$8 sm:$0xf] }
 0x216   :  { %v694_v18 = vmul.f32 %v680_v7, %v669_v17  ;;  %v695_v19 = vmul.f32 %v684_v8, %v668_v16 }
 0x217   :  { %v959_v39 = vld [vmem:[#allocation2 + $0x8] sm:$0xff]  ;;  %v960_v59 = vld [vmem:[#allocation2 + $0x10] sm:$0xff] }
 0x218   :  { %698 = vst [vmem:[#allocation2 + $0x28] sm:$0xf] %v694_v18  ;;  %699 = vst [vmem:[#allocation2 + $0x30] sm:$0xf] %v695_v19  ;;  %v706_v23 = vpop.permute.xlu0 %705  ;;  %v666_v24 = vpop.permute.xlu1 %665  ;;  %v806_v18 = vrot.slane %v1175_v6, %v1410_v10  ;;  %v810_v19 = vrot.slane %v1175_v6, %v1412_v11 }
 0x219   :  { %v667_v25 = vsel %vm120_vm1, %v664_v62, %v666_v24  ;;  %v670_v26 = vsel %vm120_vm1, %v666_v24, %v660_v53 }
 0x21a   :  { %v693_v27 = vmul.f32 %v676_v20, %v670_v26  ;;  %v696_v28 = vmul.f32 %v688_v21, %v667_v25  ;;  %v814_v26 = vrot.slane %v1175_v6, %v1414_v12 }
 0x21b   :  { %v958_v50 = vld [vmem:[#allocation2] sm:$0xff]  ;;  %v961_v53 = vld [vmem:[#allocation2 + $0x18] sm:$0xff] }
 0x21c   :  { %697 = vst [vmem:[#allocation2 + $0x20] sm:$0xf] %v693_v27  ;;  %700 = vst [vmem:[#allocation2 + $0x38] sm:$0xf] %v696_v28  ;;  %v744_v31 = vpop.permute.xlu0 %743  ;;  %v704_v32 = vpop.permute.xlu1 %703  ;;  %v818_v27 = vrot.slane %v1175_v6, %v1416_v13 }
 0x21d   :  { %v710_v33 = vsel %vm164_vm2, %v704_v32, %v706_v23  ;;  %v711_v34 = vsel %vm164_vm2, %v702_v14, %v704_v32 }
 0x21e   :  { %v736_v35 = vmul.f32 %v722_v29, %v711_v34  ;;  %v737_v36 = vmul.f32 %v726_v30, %v710_v33  ;;  %v1176_v30 = vld [vmem:[%s1723_s0 + $0x6] ss:$8 sm:$0xf] }
 0x21f   :  { %v963_v40 = vld [vmem:[#allocation2 + $0x28] sm:$0xff]  ;;  %v964_v51 = vld [vmem:[#allocation2 + $0x30] sm:$0xff] }
 0x220   :  { %740 = vst [vmem:[#allocation2 + $0x48] sm:$0xf] %v736_v35  ;;  %741 = vst [vmem:[#allocation2 + $0x50] sm:$0xf] %v737_v36  ;;  %v748_v42 = vpop.permute.xlu0 %747  ;;  %v708_v43 = vpop.permute.xlu1 %707  ;;  %v1213_v44 = vpack.c.bf16 %v963_v40, %v959_v39  ;;  %v1231_v62 = vpack.c.bf16 %v964_v51, %v960_v59  ;;  %v852_v39 = vrot.slane %v1176_v30, %v1412_v11 }
 0x221   :  { %v709_v45 = vsel %vm164_vm2, %v706_v23, %v708_v43  ;;  %v712_v46 = vsel %vm164_vm2, %v708_v43, %v702_v14 }
 0x222   :  { %v735_v47 = vmul.f32 %v718_v37, %v712_v46  ;;  %v738_v2 = vmul.f32 %v730_v38, %v709_v45  ;;  %1214 = vmatprep.subr.bf16.mxu0 %v1213_v44  ;;  %v848_v38 = vrot.slane %v1176_v30, %v1410_v10 }
 0x223   :  { %v962_v52 = vld [vmem:[#allocation2 + $0x20] sm:$0xff]  ;;  %v965_v54 = vld [vmem:[#allocation2 + $0x38] sm:$0xff] }
 0x224   :  { %739 = vst [vmem:[#allocation2 + $0x40] sm:$0xf] %v735_v47  ;;  %742 = vst [vmem:[#allocation2 + $0x58] sm:$0xf] %v738_v2  ;;  %v790_v55 = vpop.permute.xlu0 %789  ;;  %v746_v56 = vpop.permute.xlu1 %745  ;;  %v1215_v57 = vpack.c.bf16 %v962_v52, %v958_v50  ;;  %v1229_v58 = vpack.c.bf16 %v965_v54, %v961_v53  ;;  %v856_v52 = vrot.slane %v1176_v30, %v1414_v12 }
 0x225   :  { %v752_v60 = vsel %vm208_vm3, %v746_v56, %v748_v42  ;;  %v753_v61 = vsel %vm208_vm3, %v744_v31, %v746_v56  ;;  %v975_v56 = vld [vmem:[#allocation2 + $0x88] sm:$0xff] }
 0x226   :  { %v778_v3 = vmul.f32 %v764_v48, %v753_v61  ;;  %v779_v4 = vmul.f32 %v768_v49, %v752_v60  ;;  %1216 = vmatpush1.bf16.msra.mxu0 %v1215_v57  ;;  %1230 = vmatprep.subr.bf16.mxu1 %v1229_v58  ;;  %v974_v57 = vld [vmem:[#allocation2 + $0x80] sm:$0xff] }
 0x227   :  { %1232 = vmatpush1.bf16.msra.mxu1 %v1231_v62  ;;  %v967_v28 = vld [vmem:[#allocation2 + $0x48] sm:$0xff]  ;;  %v968_v48 = vld [vmem:[#allocation2 + $0x50] sm:$0xff] }
 0x228   :  { %782 = vst [vmem:[#allocation2 + $0x68] sm:$0xf] %v778_v3  ;;  %783 = vst [vmem:[#allocation2 + $0x70] sm:$0xf] %v779_v4  ;;  %v794_v7 = vpop.permute.xlu0 %793  ;;  %v750_v8 = vpop.permute.xlu1 %749 }
 0x229   :  { %v751_v14 = vsel %vm208_vm3, %v748_v42, %v750_v8  ;;  %v754_v15 = vsel %vm208_vm3, %v750_v8, %v744_v31  ;;  %v1177_v60 = vld [vmem:[%s1723_s0 + $0x7] ss:$8 sm:$0xf] }
 0x22a   :  { %v777_v16 = vmul.f32 %v760_v63, %v754_v15  ;;  %v780_v17 = vmul.f32 %v772_v5, %v751_v14  ;;  %v890_v8 = vrot.slane %v1177_v60, %v1410_v10  ;;  %v894_v14 = vrot.slane %v1177_v60, %v1412_v11  ;;  %v976_v15 = vld [vmem:[#allocation2 + $0x90] sm:$0xff] }
 0x22b   :  { %v966_v40 = vld [vmem:[#allocation2 + $0x40] sm:$0xff]  ;;  %v969_v43 = vld [vmem:[#allocation2 + $0x58] sm:$0xff] }
 0x22c   :  { %781 = vst [vmem:[#allocation2 + $0x60] sm:$0xf] %v777_v16  ;;  %784 = vst [vmem:[#allocation2 + $0x78] sm:$0xf] %v780_v17  ;;  %v832_v20 = vpop.permute.xlu0 %831  ;;  %v792_v21 = vpop.permute.xlu1 %791  ;;  %v977_v16 = vld [vmem:[#allocation2 + $0x98] sm:$0xff] }
 0x22d   :  { %v798_v22 = vsel %vm256_vm4, %v792_v21, %v794_v7  ;;  %v799_v23 = vsel %vm256_vm4, %v790_v55, %v792_v21 }
 0x22e   :  { %v823_v24 = vmul.f32 %v806_v18, %v799_v23  ;;  %v824_v25 = vmul.f32 %v810_v19, %v798_v22 }
 0x22f   :  { %v971_v29 = vld [vmem:[#allocation2 + $0x68] sm:$0xff]  ;;  %v972_v41 = vld [vmem:[#allocation2 + $0x70] sm:$0xff] }
 0x230   :  { %827 = vst [vmem:[#allocation2 + $0xa0] sm:$0xf] %v823_v24  ;;  %828 = vst [vmem:[#allocation2 + $0xa8] sm:$0xf] %v824_v25  ;;  %v836_v31 = vpop.permute.xlu0 %835  ;;  %v796_v32 = vpop.permute.xlu1 %795  ;;  %v1217_v33 = vpack.c.bf16 %v971_v29, %v967_v28  ;;  %v1235_v51 = vpack.c.bf16 %v972_v41, %v968_v48  ;;  %v902_v28 = vrot.slane %v1177_v60, %v1416_v13 }
 0x231   :  { %v797_v34 = vsel %vm256_vm4, %v794_v7, %v796_v32  ;;  %v800_v35 = vsel %vm256_vm4, %v796_v32, %v790_v55  ;;  %v860_v55 = vrot.slane %v1176_v30, %v1416_v13  ;;  %v1178_v29 = vld [vmem:[%s1723_s0 + $0x20] ss:$8 sm:$0xf] }
 0x232   :  { %v825_v36 = vmul.f32 %v814_v26, %v797_v34  ;;  %v826_v37 = vmul.f32 %v818_v27, %v800_v35  ;;  %1218 = vmatprep.subr.bf16.mxu0 %v1217_v33  ;;  %v898_v27 = vrot.slane %v1177_v60, %v1414_v12  ;;  %v932_v35 = vrot.slane %v1178_v29, %v1410_v10 }
 0x233   :  { %v970_v42 = vld [vmem:[#allocation2 + $0x60] sm:$0xff]  ;;  %v973_v44 = vld [vmem:[#allocation2 + $0x78] sm:$0xff] }
 0x234   :  { %829 = vst [vmem:[#allocation2 + $0xb0] sm:$0xf] %v825_v36  ;;  %830 = vst [vmem:[#allocation2 + $0xb8] sm:$0xf] %v826_v37  ;;  %v874_v45 = vpop.permute.xlu0 %873  ;;  %v834_v46 = vpop.permute.xlu1 %833  ;;  %v1219_v47 = vpack.c.bf16 %v970_v42, %v966_v40  ;;  %v1233_v2 = vpack.c.bf16 %v973_v44, %v969_v43  ;;  %v936_v36 = vrot.slane %v1178_v29, %v1412_v11 }
 0x235   :  { %v840_v49 = vsel %vm300_vm5, %v834_v46, %v836_v31  ;;  %v841_v50 = vsel %vm300_vm5, %v832_v20, %v834_v46  ;;  %v940_v43 = vrot.slane %v1178_v29, %v1414_v12  ;;  %v944_v44 = vrot.slane %v1178_v29, %v1416_v13 }
 0x236   :  { %v865_v53 = vmul.f32 %v848_v38, %v841_v50  ;;  %v866_v54 = vmul.f32 %v852_v39, %v840_v49  ;;  %1220 = vmatpush1.bf16.msra.mxu0 %v1219_v47  ;;  %1234 = vmatprep.subr.bf16.mxu1 %v1233_v2 }
 0x237   :  { %1236 = vmatpush1.bf16.msra.mxu1 %v1235_v51  ;;  %v979_v58 = vld [vmem:[#allocation2 + $0xa8] sm:$0xff]  ;;  %v978_v59 = vld [vmem:[#allocation2 + $0xa0] sm:$0xff] }
 0x238   :  { %869 = vst [vmem:[#allocation2 + $0xc0] sm:$0xf] %v865_v53  ;;  %870 = vst [vmem:[#allocation2 + $0xc8] sm:$0xf] %v866_v54  ;;  %v878_v61 = vpop.permute.xlu0 %877  ;;  %v838_v62 = vpop.permute.xlu1 %837  ;;  %v1221_v63 = vpack.c.bf16 %v979_v58, %v975_v56  ;;  %v1223_v3 = vpack.c.bf16 %v978_v59, %v974_v57 }
 0x239   :  { %v839_v4 = vsel %vm300_vm5, %v836_v31, %v838_v62  ;;  %v842_v5 = vsel %vm300_vm5, %v838_v62, %v832_v20 }
 0x23a   :  { %v867_v6 = vmul.f32 %v856_v52, %v839_v4  ;;  %v868_v7 = vmul.f32 %v860_v55, %v842_v5  ;;  %1222 = vmatprep.subr.bf16.mxu0 %v1221_v63 }
 0x23b   :  { %1224 = vmatpush1.bf16.msra.mxu0 %v1223_v3  ;;  %v981_v17 = vld [vmem:[#allocation2 + $0xb8] sm:$0xff]  ;;  %v980_v18 = vld [vmem:[#allocation2 + $0xb0] sm:$0xff] }
 0x23c   :  { %871 = vst [vmem:[#allocation2 + $0xd0] sm:$0xf] %v867_v6  ;;  %872 = vst [vmem:[#allocation2 + $0xd8] sm:$0xf] %v868_v7  ;;  %v876_v19 = vpop.permute.xlu1 %875  ;;  %v1237_v21 = vpack.c.bf16 %v981_v17, %v977_v16  ;;  %v1239_v22 = vpack.c.bf16 %v980_v18, %v976_v15  ;;  %v916_v24 = vpop.permute.xlu0 %915 }
 0x23d   :  { %v882_v20 = vsel %vm344_vm6, %v876_v19, %v878_v61  ;;  %v883_v23 = vsel %vm344_vm6, %v874_v45, %v876_v19 }
 0x23e   :  { %v907_v25 = vmul.f32 %v890_v8, %v883_v23  ;;  %v908_v26 = vmul.f32 %v894_v14, %v882_v20  ;;  %1238 = vmatprep.subr.bf16.mxu1 %v1237_v21 }
 0x23f   :  { %1240 = vmatpush1.bf16.msra.mxu1 %v1239_v22  ;;  %v982_v46 = vld [vmem:[#allocation2 + $0xc0] sm:$0xff] }
 0x240   :  { %911 = vst [vmem:[#allocation2 + $0xe0] sm:$0xf] %v907_v25  ;;  %912 = vst [vmem:[#allocation2 + $0xe8] sm:$0xf] %v908_v26  ;;  %v880_v30 = vpop.permute.xlu1 %879  ;;  %v920_v37 = vpop.permute.xlu0 %919 }
 0x241   :  { %v881_v31 = vsel %vm344_vm6, %v878_v61, %v880_v30  ;;  %v884_v32 = vsel %vm344_vm6, %v880_v30, %v874_v45  ;;  %v983_v45 = vld [vmem:[#allocation2 + $0xc8] sm:$0xff] }
 0x242   :  { %v909_v33 = vmul.f32 %v898_v27, %v881_v31  ;;  %v910_v34 = vmul.f32 %v902_v28, %v884_v32 }
 0x243   :  { %v985_v12 = vld [vmem:[#allocation2 + $0xd8] sm:$0xff]  ;;  %v984_v53 = vld [vmem:[#allocation2 + $0xd0] sm:$0xff] }
 0x244   :  { %913 = vst [vmem:[#allocation2 + $0xf0] sm:$0xf] %v909_v33  ;;  %914 = vst [vmem:[#allocation2 + $0xf8] sm:$0xf] %v910_v34  ;;  %v918_v38 = vpop.permute.xlu1 %917 }
 0x245   :  { %v924_v39 = vsel %vm388_vm7, %v918_v38, %v920_v37  ;;  %v925_v40 = vsel %vm388_vm7, %v916_v24, %v918_v38 }
 0x246   :  { %v949_v41 = vmul.f32 %v932_v35, %v925_v40  ;;  %v950_v42 = vmul.f32 %v936_v36, %v924_v39 }
 0x247   :  { %v987_v10 = vld [vmem:[#allocation2 + $0xe8] sm:$0xff]  ;;  %v986_v11 = vld [vmem:[#allocation2 + $0xe0] sm:$0xff] }
 0x248   :  { %953 = vst [vmem:[#allocation2 + $0x100] sm:$0xf] %v949_v41  ;;  %954 = vst [vmem:[#allocation2 + $0x108] sm:$0xf] %v950_v42  ;;  %v922_v47 = vpop.permute.xlu1 %921  ;;  %v1225_v2 = vpack.c.bf16 %v987_v10, %v983_v45  ;;  %v1227_v48 = vpack.c.bf16 %v986_v11, %v982_v46 }
 0x249   :  { %v923_v49 = vsel %vm388_vm7, %v920_v37, %v922_v47  ;;  %v926_v50 = vsel %vm388_vm7, %v922_v47, %v916_v24 }
 0x24a   :  { %v951_v51 = vmul.f32 %v940_v43, %v923_v49  ;;  %v952_v52 = vmul.f32 %v944_v44, %v926_v50  ;;  %1226 = vmatprep.subr.bf16.mxu0 %v1225_v2 }
 0x24b   :  { %1228 = vmatpush1.bf16.msra.mxu0 %v1227_v48  ;;  %v989_v13 = vld [vmem:[#allocation2 + $0xf8] sm:$0xff]  ;;  %v988_v54 = vld [vmem:[#allocation2 + $0xf0] sm:$0xff] }
 0x24c   :  { %955 = vst [vmem:[#allocation2 + $0x110] sm:$0xf] %v951_v51  ;;  %956 = vst [vmem:[#allocation2 + $0x118] sm:$0xf] %v952_v52  ;;  %v1241_v55 = vpack.c.bf16 %v989_v13, %v985_v12  ;;  %v1243_v56 = vpack.c.bf16 %v988_v54, %v984_v53 }
 0x24e   :  { %1242 = vmatprep.subr.bf16.mxu1 %v1241_v55 }
 0x24f   :  { %1244 = vmatpush1.bf16.msra.mxu1 %v1243_v56  ;;  %v991_v57 = vld [vmem:[#allocation2 + $0x108] sm:$0xff]  ;;  %v990_v58 = vld [vmem:[#allocation2 + $0x100] sm:$0xff] }
 0x250   :  { %1019 = vmatprep.subr.mxu0 %v991_v57 }
 0x251   :  { %1020 = vmatpush1.msra.mxu0 %v990_v58  ;;  %v998_v61 = vpop.permute.xlu0 %997 }
 0x252   :  { %1179 = vmatmul.mubr.msk.f32.vlgmr.msra.gmra.mrb[2].mxu0 %vm467_vm8, %v957_v9 }
 0x253   :  { %v993_v59 = vld [vmem:[#allocation2 + $0x118] sm:$0xff]  ;;  %v992_v60 = vld [vmem:[#allocation2 + $0x110] sm:$0xff] }
 0x254   :  { %1090 = vmatprep.subr.mxu1 %v993_v59 }
 0x255   :  { %1091 = vmatpush1.msra.mxu1 %v992_v60 }
 0x256   :  { %1180 = vmatmul.mubr.msk.f32.vlgmr.msra.gmra.mrb[2].mxu1 %vm467_vm8, %v957_v9 }
 0x325   :  { %v1069_v62 = vpop.f32.mrb[2].mxu0 }
 0x326   :  { %v1070_v63 = vadd.f32 %v1069_v62, %v998_v61  ;;  %v1071_v3 = vpop.f32.mrb[3].mxu0 }
 0x327   :  { %v1072_v4 = vadd.f32 %v1071_v3, %v998_v61 }
 0x329   :  { %v1149_v5 = vcombine.low %v1070_v63, %v1072_v4  ;;  %v1140_v6 = vpop.f32.mrb[2].mxu1 }
 0x32a   :  { %v1141_v7 = vadd.f32 %v1140_v6, %v998_v61  ;;  %v1142_v8 = vpop.f32.mrb[3].mxu1 }
 0x32b   :  { %v1153_v14 = vadd.f32 %v1149_v5, %v1311_v1  ;;  %v1143_v15 = vadd.f32 %v1142_v8, %v998_v61 }
 0x32d   :  { %v1155_v16 = vmax.f32 %v1153_v14, 0.0  ;;  %v1150_v17 = vcombine.low %v1141_v7, %v1143_v15 }
 0x32f   :  { %1157 = vst [vmem:[%s1727_s6] sm:$0xff] %v1155_v16  ;;  %v1154_v18 = vadd.f32 %v1150_v17, %v1306_v0 }
 0x331   :  { %v1156_v19 = vmax.f32 %v1154_v18, 0.0 }
 0x333   :  { %1158 = vst [vmem:[%s1727_s6 + $0x8] sm:$0xff] %v1156_v19 }

</bundles_post_ra>
